<compile_context>
chip_gen: v6e
topology: v6e:2x2x1
jax: 0.10.0
libtpu: 0.0.40
codegen_flags: <defaults>
</compile_context>

<pallas_src>
import functools

import jax
import jax.numpy as jnp
from jax.experimental import pallas as pl
from jax.experimental.pallas import tpu as pltpu


# ------------------------- fused RNN + GatedCNN kernel ----------------------
def rcnn_fused_kernel(x_ref, wih_ref, whh_ref, bias_ref, wc_ref, o_ref,
                      h_scr, y_scr, *, Tc, B, H, K, pad, mm_dtype):
    # x_ref / o_ref blocks: (Tc*B, H); row r = t*B + b (row-major over (t, b)).
    @pl.when(pl.program_id(0) == 0)
    def _init():
        h_scr[...] = jnp.zeros_like(h_scr)   # h_0 = 0
        y_scr[...] = jnp.zeros_like(y_scr)   # conv zero-pad rows stay 0 forever

    # (1) Hoisted input projection for the whole chunk: one MXU matmul, M = Tc*B.
    xb = x_ref[...].astype(mm_dtype)                                   # (Tc*B, H)
    xp = (jnp.dot(xb, wih_ref[...], preferred_element_type=jnp.float32)
          + bias_ref[...])                                             # f32

    # (2) Sequential recurrence: critical path = one (B,H)@(H,H) matmul + tanh
    #     per step.  Static Python loop == lax.fori_loop(..., unroll=True) for
    #     this small, static Tc (keeps all indices static).
    whh = whh_ref[...]
    h = h_scr[...]                                                     # (B, H) f32
    for i in range(Tc):
        h = jnp.tanh(
            xp[i * B:(i + 1) * B, :]
            + jnp.dot(h.astype(mm_dtype), whh,
                      preferred_element_type=jnp.float32))
        y_scr[i, pad:pad + B, :] = h          # write into padded slot of step i
    h_scr[...] = h                            # carry hidden state across chunks

    # (3) Gated conv over the batch axis (module's transpose->Conv1d->transpose),
    #     T folded into the matmul M dimension, a|b weights concatenated (one
    #     dot per tap producing 2H output channels).
    yc = y_scr[...]                           # (Tc, B + 2*pad, H) f32
    acc = jnp.zeros((Tc * B, 2 * H), jnp.float32)
    for j in range(K):                        # static tap loop
        win = yc[:, j:j + B, :].reshape(Tc * B, H).astype(mm_dtype)
        acc = acc + jnp.dot(win, wc_ref[j], preferred_element_type=jnp.float32)
    a = acc[:, :H]
    g = acc[:, H:]
    o_ref[...] = (a * jax.nn.sigmoid(g)).astype(o_ref.dtype)


def _pick_chunk(T, B, max_chunk=16):
    """Largest divisor of T (<= max_chunk) keeping the row block 8-aligned."""
    for c in range(min(T, max_chunk), 0, -1):
        if T % c == 0 and (c * B) % 8 == 0:
            return c
    return T  # block == full array -> always a legal BlockSpec


# --------------------------------- wrapper -----------------------------------
@functools.partial(jax.jit, static_argnames=("kernel_size", "matmul_dtype"))
def rcnn_forward(x, params, kernel_size=3, matmul_dtype=jnp.bfloat16):
    T, B, H = x.shape
    pad = (kernel_size - 1) // 2
    Tc = _pick_chunk(T, B)
    nT = T // Tc

    # RNN weights (transposed once, cast to MXU-native dtype; bias stays f32).
    wih_t = params["w_ih"].T.astype(matmul_dtype)                    # (H, H)
    whh_t = params["w_hh"].T.astype(matmul_dtype)                    # (H, H)
    bias = (params["b_ih"] + params["b_hh"]).astype(jnp.float32).reshape(1, H)

    # Conv weights: PyTorch (c_out, c_in, k) -> (k, c_in, c_out); concat a|b.
    wc = jnp.concatenate(
        [jnp.transpose(params["w_cnn"], (2, 1, 0)),
         jnp.transpose(params["w_gate"], (2, 1, 0))], axis=-1
    ).astype(matmul_dtype)                                           # (K, H, 2H)

    x2 = x.reshape(T * B, H)                                         # free reshape

    kernel = functools.partial(
        rcnn_fused_kernel,
        Tc=Tc, B=B, H=H, K=kernel_size, pad=pad, mm_dtype=matmul_dtype)

    out2 = pl.pallas_call(
        kernel,
        out_shape=jax.ShapeDtypeStruct((T * B, H), x.dtype),
        grid_spec=pltpu.PrefetchScalarGridSpec(
            num_scalar_prefetch=0,
            grid=(nT,),
            in_specs=[
                pl.BlockSpec((Tc * B, H), lambda t: (t, 0)),          # x chunk
                pl.BlockSpec((H, H), lambda t: (0, 0)),               # W_ih^T
                pl.BlockSpec((H, H), lambda t: (0, 0)),               # W_hh^T
                pl.BlockSpec((1, H), lambda t: (0, 0)),               # bias
                pl.BlockSpec((kernel_size, H, 2 * H), lambda t: (0, 0, 0)),  # conv W
            ],
            out_specs=pl.BlockSpec((Tc * B, H), lambda t: (t, 0)),
            scratch_shapes=[
                pltpu.VMEM((B, H), jnp.float32),                      # hidden state
                pltpu.VMEM((Tc, B + 2 * pad, H), jnp.float32),        # padded y chunk
            ],
        ),
        compiler_params=pltpu.CompilerParams(
            dimension_semantics=("arbitrary",),      # sequential recurrence
            vmem_limit_bytes=32 * 1024 * 1024,       # safe on v5e/v6e/v7x budgets
        ),
    )(x2, wih_t, whh_t, bias, wc)

    return out2.reshape(T, B, H)


# ----------------------------- pure-JAX reference ----------------------------
def rcnn_reference(x, params, kernel_size=3):
    T, B, H = x.shape
    pad = (kernel_size - 1) // 2

    def step(h, xt):
        h = jnp.tanh(xt @ params["w_ih"].T + params["b_ih"]
                     + h @ params["w_hh"].T + params["b_hh"])
        return h, h

    _, y = jax.lax.scan(step, jnp.zeros((B, H), x.dtype), x)

    yp = jnp.pad(y, ((0, 0), (pad, pad), (0, 0)))

    def conv(w):  # w: (c_out, c_in, k)
        out = jnp.zeros((T, B, H), jnp.float32)
        for j in range(kernel_size):
            out = out + jnp.einsum("tbi,oi->tbo", yp[:, j:j + B, :], w[:, :, j])
        return out

    a = conv(params["w_cnn"])
    b = conv(params["w_gate"])
    return a * jax.nn.sigmoid(b)


if __name__ == "__main__":
    T, B, H, K = 8, 4, 32, 3   # seq=8, batch=4, hidden=32, kernel_size=3

    key = jax.random.PRNGKey(0)
    ks = jax.random.split(key, 7)
    s = float(1.0 / (H ** 0.5))
    params = {
        "w_ih":   jax.random.uniform(ks[0], (H, H), jnp.float32, -s, s),
        "w_hh":   jax.random.uniform(ks[1], (H, H), jnp.float32, -s, s),
        "b_ih":   jax.random.uniform(ks[2], (H,),   jnp.float32, -s, s),
        "b_hh":   jax.random.uniform(ks[3], (H,),   jnp.float32, -s, s),
        "w_cnn":  jax.random.uniform(ks[4], (H, H, K), jnp.float32, -s, s),
        "w_gate": jax.random.uniform(ks[5], (H, H, K), jnp.float32, -s, s),
    }
    x = jax.random.normal(ks[6], (T, B, H), jnp.float32)

    ref = rcnn_reference(x, params, kernel_size=K)

    # 1) f32 matmul path: strict structural/numerical check of the fused kernel.
    out_f32 = jax.block_until_ready(
        rcnn_forward(x, params, kernel_size=K, matmul_dtype=jnp.float32))
    assert out_f32.shape == (T, B, H)
    assert jnp.allclose(out_f32, ref, atol=5e-2, rtol=5e-2), "f32 mismatch vs reference"

    # 2) bf16 matmul-operand path (MXU-native perf config, f32 accumulation):
    #    looser tolerance for bf16 operand rounding through the recurrence.
    out_bf16 = jax.block_until_ready(
        rcnn_forward(x, params, kernel_size=K, matmul_dtype=jnp.bfloat16))
    assert out_bf16.shape == (T, B, H)
    assert jnp.allclose(out_bf16, ref, atol=1.5e-1, rtol=1.5e-1), "bf16 mismatch vs reference"

    print("KERNEL_OK")
</pallas_src>

<mosaic_0001>
module attributes {stable_mosaic.version = 11 : i64} {
  func.func @rcnn_fused_kernel(%arg0: i32, %arg1: memref<32x32xf32, #tpu.memory_space<vmem>>, %arg2: memref<32x32xf32, #tpu.memory_space<vmem>>, %arg3: memref<32x32xf32, #tpu.memory_space<vmem>>, %arg4: memref<1x32xf32, #tpu.memory_space<vmem>>, %arg5: memref<3x32x64xf32, #tpu.memory_space<vmem>>, %arg6: memref<32x32xf32, #tpu.memory_space<vmem>>, %arg7: memref<4x32xf32, #tpu.memory_space<vmem>>, %arg8: memref<8x6x32xf32, #tpu.memory_space<vmem>>) attributes {dimension_semantics = [#tpu.dimension_semantics<arbitrary>], iteration_bounds = array<i64: 1>, scalar_prefetch = 0 : i64, scratch_operands = 2 : i64, tpu.core_type = #tpu.core_type<tc>, window_params = [{transform_indices = @transform_0, window_bounds = array<i64: 32, 32>}, {pipeline_mode = #tpu.pipeline_mode<synchronous>, transform_indices = @transform_1, window_bounds = array<i64: 32, 32>}, {pipeline_mode = #tpu.pipeline_mode<synchronous>, transform_indices = @transform_2, window_bounds = array<i64: 32, 32>}, {pipeline_mode = #tpu.pipeline_mode<synchronous>, transform_indices = @transform_3, window_bounds = array<i64: 1, 32>}, {pipeline_mode = #tpu.pipeline_mode<synchronous>, transform_indices = @transform_4, window_bounds = array<i64: 3, 32, 64>}, {transform_indices = @transform_5, window_bounds = array<i64: 32, 32>}]} {
    %c0_i32 = arith.constant 0 : i32
    %0 = arith.cmpi eq, %arg0, %c0_i32 : i32
    %1 = arith.extui %0 : i1 to i32
    %c0_i32_0 = arith.constant 0 : i32
    %2 = arith.cmpi ne, %1, %c0_i32_0 : i32
    scf.if %2 {
      %cst_56 = arith.constant 0.000000e+00 : f32
      %97 = vector.broadcast %cst_56 : f32 to vector<4x32xf32>
      %c0_57 = arith.constant 0 : index
      %c0_58 = arith.constant 0 : index
      %98 = vector.load %arg7[%c0_57, %c0_58] : memref<4x32xf32, #tpu.memory_space<vmem>>, vector<4x32xf32>
      tpu.vector_store %arg7[%c0_57, %c0_58], %97 {strides = array<i32>} : memref<4x32xf32, #tpu.memory_space<vmem>>, vector<4x32xf32>,
      %cst_59 = arith.constant 0.000000e+00 : f32
      %99 = vector.broadcast %cst_59 : f32 to vector<8x6x32xf32>
      %c0_60 = arith.constant 0 : index
      %c0_61 = arith.constant 0 : index
      %c0_62 = arith.constant 0 : index
      %100 = vector.load %arg8[%c0_60, %c0_61, %c0_62] : memref<8x6x32xf32, #tpu.memory_space<vmem>>, vector<8x6x32xf32>
      tpu.vector_store %arg8[%c0_60, %c0_61, %c0_62], %99 {strides = array<i32>} : memref<8x6x32xf32, #tpu.memory_space<vmem>>, vector<8x6x32xf32>,
    } else {
    }
    %c0 = arith.constant 0 : index
    %c0_1 = arith.constant 0 : index
    %3 = vector.load %arg1[%c0, %c0_1] : memref<32x32xf32, #tpu.memory_space<vmem>>, vector<32x32xf32>
    %c0_2 = arith.constant 0 : index
    %c0_3 = arith.constant 0 : index
    %4 = vector.load %arg2[%c0_2, %c0_3] : memref<32x32xf32, #tpu.memory_space<vmem>>, vector<32x32xf32>
    %cst = arith.constant dense<0.000000e+00> : vector<32x32xf32>
    %5 = tpu.matmul %3, %4, %cst {dimension_numbers = #tpu.dot_dimension_numbers<[1], [0], [0], [1], [0, 0, 1, 1], [], []>} : vector<32x32xf32>, vector<32x32xf32>, vector<32x32xf32> -> vector<32x32xf32>
    %c0_4 = arith.constant 0 : index
    %c0_5 = arith.constant 0 : index
    %6 = vector.load %arg4[%c0_4, %c0_5] : memref<1x32xf32, #tpu.memory_space<vmem>>, vector<1x32xf32>
    %7 = vector.broadcast %6 : vector<1x32xf32> to vector<32x32xf32>
    %8 = arith.addf %5, %7 : vector<32x32xf32>
    %c0_6 = arith.constant 0 : index
    %c0_7 = arith.constant 0 : index
    %9 = vector.load %arg3[%c0_6, %c0_7] : memref<32x32xf32, #tpu.memory_space<vmem>>, vector<32x32xf32>
    %c0_8 = arith.constant 0 : index
    %c0_9 = arith.constant 0 : index
    %10 = vector.load %arg7[%c0_8, %c0_9] : memref<4x32xf32, #tpu.memory_space<vmem>>, vector<4x32xf32>
    %11 = vector.extract_strided_slice %8 {offsets = [0, 0], sizes = [4, 32], strides = [1, 1]} : vector<32x32xf32> to vector<4x32xf32>
    %cst_10 = arith.constant dense<0.000000e+00> : vector<4x32xf32>
    %12 = tpu.matmul %10, %9, %cst_10 {dimension_numbers = #tpu.dot_dimension_numbers<[1], [0], [0], [1], [0, 0, 1, 1], [], []>} : vector<4x32xf32>, vector<32x32xf32>, vector<4x32xf32> -> vector<4x32xf32>
    %13 = arith.addf %11, %12 : vector<4x32xf32>
    %14 = math.tanh %13 : vector<4x32xf32>
    %c0_11 = arith.constant 0 : index
    %c1 = arith.constant 1 : index
    %c0_12 = arith.constant 0 : index
    %15 = vector.load %arg8[%c0_11, %c1, %c0_12] : memref<8x6x32xf32, #tpu.memory_space<vmem>>, vector<1x4x32xf32>
    %16 = vector.shape_cast %15 : vector<1x4x32xf32> to vector<4x32xf32>
    %17 = vector.shape_cast %14 : vector<4x32xf32> to vector<1x4x32xf32>
    tpu.vector_store %arg8[%c0_11, %c1, %c0_12], %17 {strides = array<i32>} : memref<8x6x32xf32, #tpu.memory_space<vmem>>, vector<1x4x32xf32>,
    %18 = vector.extract_strided_slice %8 {offsets = [4, 0], sizes = [4, 32], strides = [1, 1]} : vector<32x32xf32> to vector<4x32xf32>
    %cst_13 = arith.constant dense<0.000000e+00> : vector<4x32xf32>
    %19 = tpu.matmul %14, %9, %cst_13 {dimension_numbers = #tpu.dot_dimension_numbers<[1], [0], [0], [1], [0, 0, 1, 1], [], []>} : vector<4x32xf32>, vector<32x32xf32>, vector<4x32xf32> -> vector<4x32xf32>
    %20 = arith.addf %18, %19 : vector<4x32xf32>
    %21 = math.tanh %20 : vector<4x32xf32>
    %c1_14 = arith.constant 1 : index
    %c1_15 = arith.constant 1 : index
    %c0_16 = arith.constant 0 : index
    %22 = vector.load %arg8[%c1_14, %c1_15, %c0_16] : memref<8x6x32xf32, #tpu.memory_space<vmem>>, vector<1x4x32xf32>
    %23 = vector.shape_cast %22 : vector<1x4x32xf32> to vector<4x32xf32>
    %24 = vector.shape_cast %21 : vector<4x32xf32> to vector<1x4x32xf32>
    tpu.vector_store %arg8[%c1_14, %c1_15, %c0_16], %24 {strides = array<i32>} : memref<8x6x32xf32, #tpu.memory_space<vmem>>, vector<1x4x32xf32>,
    %25 = vector.extract_strided_slice %8 {offsets = [8, 0], sizes = [4, 32], strides = [1, 1]} : vector<32x32xf32> to vector<4x32xf32>
    %cst_17 = arith.constant dense<0.000000e+00> : vector<4x32xf32>
    %26 = tpu.matmul %21, %9, %cst_17 {dimension_numbers = #tpu.dot_dimension_numbers<[1], [0], [0], [1], [0, 0, 1, 1], [], []>} : vector<4x32xf32>, vector<32x32xf32>, vector<4x32xf32> -> vector<4x32xf32>
    %27 = arith.addf %25, %26 : vector<4x32xf32>
    %28 = math.tanh %27 : vector<4x32xf32>
    %c2 = arith.constant 2 : index
    %c1_18 = arith.constant 1 : index
    %c0_19 = arith.constant 0 : index
    %29 = vector.load %arg8[%c2, %c1_18, %c0_19] : memref<8x6x32xf32, #tpu.memory_space<vmem>>, vector<1x4x32xf32>
    %30 = vector.shape_cast %29 : vector<1x4x32xf32> to vector<4x32xf32>
    %31 = vector.shape_cast %28 : vector<4x32xf32> to vector<1x4x32xf32>
    tpu.vector_store %arg8[%c2, %c1_18, %c0_19], %31 {strides = array<i32>} : memref<8x6x32xf32, #tpu.memory_space<vmem>>, vector<1x4x32xf32>,
    %32 = vector.extract_strided_slice %8 {offsets = [12, 0], sizes = [4, 32], strides = [1, 1]} : vector<32x32xf32> to vector<4x32xf32>
    %cst_20 = arith.constant dense<0.000000e+00> : vector<4x32xf32>
    %33 = tpu.matmul %28, %9, %cst_20 {dimension_numbers = #tpu.dot_dimension_numbers<[1], [0], [0], [1], [0, 0, 1, 1], [], []>} : vector<4x32xf32>, vector<32x32xf32>, vector<4x32xf32> -> vector<4x32xf32>
    %34 = arith.addf %32, %33 : vector<4x32xf32>
    %35 = math.tanh %34 : vector<4x32xf32>
    %c3 = arith.constant 3 : index
    %c1_21 = arith.constant 1 : index
    %c0_22 = arith.constant 0 : index
    %36 = vector.load %arg8[%c3, %c1_21, %c0_22] : memref<8x6x32xf32, #tpu.memory_space<vmem>>, vector<1x4x32xf32>
    %37 = vector.shape_cast %36 : vector<1x4x32xf32> to vector<4x32xf32>
    %38 = vector.shape_cast %35 : vector<4x32xf32> to vector<1x4x32xf32>
    tpu.vector_store %arg8[%c3, %c1_21, %c0_22], %38 {strides = array<i32>} : memref<8x6x32xf32, #tpu.memory_space<vmem>>, vector<1x4x32xf32>,
    %39 = vector.extract_strided_slice %8 {offsets = [16, 0], sizes = [4, 32], strides = [1, 1]} : vector<32x32xf32> to vector<4x32xf32>
    %cst_23 = arith.constant dense<0.000000e+00> : vector<4x32xf32>
    %40 = tpu.matmul %35, %9, %cst_23 {dimension_numbers = #tpu.dot_dimension_numbers<[1], [0], [0], [1], [0, 0, 1, 1], [], []>} : vector<4x32xf32>, vector<32x32xf32>, vector<4x32xf32> -> vector<4x32xf32>
    %41 = arith.addf %39, %40 : vector<4x32xf32>
    %42 = math.tanh %41 : vector<4x32xf32>
    %c4 = arith.constant 4 : index
    %c1_24 = arith.constant 1 : index
    %c0_25 = arith.constant 0 : index
    %43 = vector.load %arg8[%c4, %c1_24, %c0_25] : memref<8x6x32xf32, #tpu.memory_space<vmem>>, vector<1x4x32xf32>
    %44 = vector.shape_cast %43 : vector<1x4x32xf32> to vector<4x32xf32>
    %45 = vector.shape_cast %42 : vector<4x32xf32> to vector<1x4x32xf32>
    tpu.vector_store %arg8[%c4, %c1_24, %c0_25], %45 {strides = array<i32>} : memref<8x6x32xf32, #tpu.memory_space<vmem>>, vector<1x4x32xf32>,
    %46 = vector.extract_strided_slice %8 {offsets = [20, 0], sizes = [4, 32], strides = [1, 1]} : vector<32x32xf32> to vector<4x32xf32>
    %cst_26 = arith.constant dense<0.000000e+00> : vector<4x32xf32>
    %47 = tpu.matmul %42, %9, %cst_26 {dimension_numbers = #tpu.dot_dimension_numbers<[1], [0], [0], [1], [0, 0, 1, 1], [], []>} : vector<4x32xf32>, vector<32x32xf32>, vector<4x32xf32> -> vector<4x32xf32>
    %48 = arith.addf %46, %47 : vector<4x32xf32>
    %49 = math.tanh %48 : vector<4x32xf32>
    %c5 = arith.constant 5 : index
    %c1_27 = arith.constant 1 : index
    %c0_28 = arith.constant 0 : index
    %50 = vector.load %arg8[%c5, %c1_27, %c0_28] : memref<8x6x32xf32, #tpu.memory_space<vmem>>, vector<1x4x32xf32>
    %51 = vector.shape_cast %50 : vector<1x4x32xf32> to vector<4x32xf32>
    %52 = vector.shape_cast %49 : vector<4x32xf32> to vector<1x4x32xf32>
    tpu.vector_store %arg8[%c5, %c1_27, %c0_28], %52 {strides = array<i32>} : memref<8x6x32xf32, #tpu.memory_space<vmem>>, vector<1x4x32xf32>,
    %53 = vector.extract_strided_slice %8 {offsets = [24, 0], sizes = [4, 32], strides = [1, 1]} : vector<32x32xf32> to vector<4x32xf32>
    %cst_29 = arith.constant dense<0.000000e+00> : vector<4x32xf32>
    %54 = tpu.matmul %49, %9, %cst_29 {dimension_numbers = #tpu.dot_dimension_numbers<[1], [0], [0], [1], [0, 0, 1, 1], [], []>} : vector<4x32xf32>, vector<32x32xf32>, vector<4x32xf32> -> vector<4x32xf32>
    %55 = arith.addf %53, %54 : vector<4x32xf32>
    %56 = math.tanh %55 : vector<4x32xf32>
    %c6 = arith.constant 6 : index
    %c1_30 = arith.constant 1 : index
    %c0_31 = arith.constant 0 : index
    %57 = vector.load %arg8[%c6, %c1_30, %c0_31] : memref<8x6x32xf32, #tpu.memory_space<vmem>>, vector<1x4x32xf32>
    %58 = vector.shape_cast %57 : vector<1x4x32xf32> to vector<4x32xf32>
    %59 = vector.shape_cast %56 : vector<4x32xf32> to vector<1x4x32xf32>
    tpu.vector_store %arg8[%c6, %c1_30, %c0_31], %59 {strides = array<i32>} : memref<8x6x32xf32, #tpu.memory_space<vmem>>, vector<1x4x32xf32>,
    %60 = vector.extract_strided_slice %8 {offsets = [28, 0], sizes = [4, 32], strides = [1, 1]} : vector<32x32xf32> to vector<4x32xf32>
    %cst_32 = arith.constant dense<0.000000e+00> : vector<4x32xf32>
    %61 = tpu.matmul %56, %9, %cst_32 {dimension_numbers = #tpu.dot_dimension_numbers<[1], [0], [0], [1], [0, 0, 1, 1], [], []>} : vector<4x32xf32>, vector<32x32xf32>, vector<4x32xf32> -> vector<4x32xf32>
    %62 = arith.addf %60, %61 : vector<4x32xf32>
    %63 = math.tanh %62 : vector<4x32xf32>
    %c7 = arith.constant 7 : index
    %c1_33 = arith.constant 1 : index
    %c0_34 = arith.constant 0 : index
    %64 = vector.load %arg8[%c7, %c1_33, %c0_34] : memref<8x6x32xf32, #tpu.memory_space<vmem>>, vector<1x4x32xf32>
    %65 = vector.shape_cast %64 : vector<1x4x32xf32> to vector<4x32xf32>
    %66 = vector.shape_cast %63 : vector<4x32xf32> to vector<1x4x32xf32>
    tpu.vector_store %arg8[%c7, %c1_33, %c0_34], %66 {strides = array<i32>} : memref<8x6x32xf32, #tpu.memory_space<vmem>>, vector<1x4x32xf32>,
    %c0_35 = arith.constant 0 : index
    %c0_36 = arith.constant 0 : index
    %67 = vector.load %arg7[%c0_35, %c0_36] : memref<4x32xf32, #tpu.memory_space<vmem>>, vector<4x32xf32>
    tpu.vector_store %arg7[%c0_35, %c0_36], %63 {strides = array<i32>} : memref<4x32xf32, #tpu.memory_space<vmem>>, vector<4x32xf32>,
    %c0_37 = arith.constant 0 : index
    %c0_38 = arith.constant 0 : index
    %c0_39 = arith.constant 0 : index
    %68 = vector.load %arg8[%c0_37, %c0_38, %c0_39] : memref<8x6x32xf32, #tpu.memory_space<vmem>>, vector<8x6x32xf32>
    %cst_40 = arith.constant 0.000000e+00 : f32
    %69 = vector.broadcast %cst_40 : f32 to vector<32x64xf32>
    %70 = vector.extract_strided_slice %68 {offsets = [0, 0, 0], sizes = [8, 4, 32], strides = [1, 1, 1]} : vector<8x6x32xf32> to vector<8x4x32xf32>
    %71 = vector.shape_cast %70 : vector<8x4x32xf32> to vector<32x32xf32>
    %c0_41 = arith.constant 0 : index
    %c0_42 = arith.constant 0 : index
    %c0_43 = arith.constant 0 : index
    %72 = vector.load %arg5[%c0_41, %c0_42, %c0_43] : memref<3x32x64xf32, #tpu.memory_space<vmem>>, vector<1x32x64xf32>
    %73 = vector.shape_cast %72 : vector<1x32x64xf32> to vector<32x64xf32>
    %cst_44 = arith.constant dense<0.000000e+00> : vector<32x64xf32>
    %74 = tpu.matmul %71, %73, %cst_44 {dimension_numbers = #tpu.dot_dimension_numbers<[1], [0], [0], [1], [0, 0, 1, 1], [], []>} : vector<32x32xf32>, vector<32x64xf32>, vector<32x64xf32> -> vector<32x64xf32>
    %75 = arith.addf %69, %74 : vector<32x64xf32>
    %76 = vector.extract_strided_slice %68 {offsets = [0, 1, 0], sizes = [8, 4, 32], strides = [1, 1, 1]} : vector<8x6x32xf32> to vector<8x4x32xf32>
    %77 = vector.shape_cast %76 : vector<8x4x32xf32> to vector<32x32xf32>
    %c1_45 = arith.constant 1 : index
    %c0_46 = arith.constant 0 : index
    %c0_47 = arith.constant 0 : index
    %78 = vector.load %arg5[%c1_45, %c0_46, %c0_47] : memref<3x32x64xf32, #tpu.memory_space<vmem>>, vector<1x32x64xf32>
    %79 = vector.shape_cast %78 : vector<1x32x64xf32> to vector<32x64xf32>
    %cst_48 = arith.constant dense<0.000000e+00> : vector<32x64xf32>
    %80 = tpu.matmul %77, %79, %cst_48 {dimension_numbers = #tpu.dot_dimension_numbers<[1], [0], [0], [1], [0, 0, 1, 1], [], []>} : vector<32x32xf32>, vector<32x64xf32>, vector<32x64xf32> -> vector<32x64xf32>
    %81 = arith.addf %75, %80 : vector<32x64xf32>
    %82 = vector.extract_strided_slice %68 {offsets = [0, 2, 0], sizes = [8, 4, 32], strides = [1, 1, 1]} : vector<8x6x32xf32> to vector<8x4x32xf32>
    %83 = vector.shape_cast %82 : vector<8x4x32xf32> to vector<32x32xf32>
    %c2_49 = arith.constant 2 : index
    %c0_50 = arith.constant 0 : index
    %c0_51 = arith.constant 0 : index
    %84 = vector.load %arg5[%c2_49, %c0_50, %c0_51] : memref<3x32x64xf32, #tpu.memory_space<vmem>>, vector<1x32x64xf32>
    %85 = vector.shape_cast %84 : vector<1x32x64xf32> to vector<32x64xf32>
    %cst_52 = arith.constant dense<0.000000e+00> : vector<32x64xf32>
    %86 = tpu.matmul %83, %85, %cst_52 {dimension_numbers = #tpu.dot_dimension_numbers<[1], [0], [0], [1], [0, 0, 1, 1], [], []>} : vector<32x32xf32>, vector<32x64xf32>, vector<32x64xf32> -> vector<32x64xf32>
    %87 = arith.addf %81, %86 : vector<32x64xf32>
    %88 = vector.extract_strided_slice %87 {offsets = [0, 0], sizes = [32, 32], strides = [1, 1]} : vector<32x64xf32> to vector<32x32xf32>
    %89 = vector.extract_strided_slice %87 {offsets = [0, 32], sizes = [32, 32], strides = [1, 1]} : vector<32x64xf32> to vector<32x32xf32>
    %90 = arith.negf %89 : vector<32x32xf32>
    %91 = math.exp %90 : vector<32x32xf32>
    %cst_53 = arith.constant 1.000000e+00 : f32
    %92 = vector.broadcast %cst_53 : f32 to vector<32x32xf32>
    %93 = arith.addf %92, %91 : vector<32x32xf32>
    %94 = arith.divf %92, %93 : vector<32x32xf32>
    %95 = arith.mulf %88, %94 : vector<32x32xf32>
    %c0_54 = arith.constant 0 : index
    %c0_55 = arith.constant 0 : index
    %96 = vector.load %arg6[%c0_54, %c0_55] : memref<32x32xf32, #tpu.memory_space<vmem>>, vector<32x32xf32>
    tpu.vector_store %arg6[%c0_54, %c0_55], %95 {strides = array<i32>} : memref<32x32xf32, #tpu.memory_space<vmem>>, vector<32x32xf32>,
    return
  }
  func.func @transform_0(%arg0: i32) -> (i32, i32) {
    %c0_i32 = arith.constant 0 : i32
    %c0_i32_0 = arith.constant 0 : i32
    return %arg0, %c0_i32 : i32, i32
  }
  func.func @transform_1(%arg0: i32) -> (i32, i32) {
    %c0_i32 = arith.constant 0 : i32
    %c0_i32_0 = arith.constant 0 : i32
    %c0_i32_1 = arith.constant 0 : i32
    return %c0_i32, %c0_i32_0 : i32, i32
  }
  func.func @transform_2(%arg0: i32) -> (i32, i32) {
    %c0_i32 = arith.constant 0 : i32
    %c0_i32_0 = arith.constant 0 : i32
    %c0_i32_1 = arith.constant 0 : i32
    return %c0_i32, %c0_i32_0 : i32, i32
  }
  func.func @transform_3(%arg0: i32) -> (i32, i32) {
    %c0_i32 = arith.constant 0 : i32
    %c0_i32_0 = arith.constant 0 : i32
    %c0_i32_1 = arith.constant 0 : i32
    return %c0_i32, %c0_i32_0 : i32, i32
  }
  func.func @transform_4(%arg0: i32) -> (i32, i32, i32) {
    %c0_i32 = arith.constant 0 : i32
    %c0_i32_0 = arith.constant 0 : i32
    %c0_i32_1 = arith.constant 0 : i32
    %c0_i32_2 = arith.constant 0 : i32
    return %c0_i32, %c0_i32_0, %c0_i32_1 : i32, i32, i32
  }
  func.func @transform_5(%arg0: i32) -> (i32, i32) {
    %c0_i32 = arith.constant 0 : i32
    %c0_i32_0 = arith.constant 0 : i32
    return %arg0, %c0_i32 : i32, i32
  }
}

</mosaic_0001>

<bundles_post_ra>
// kernel: rcnn_forward.1
= control target key start
LH: loop header
LB: loop body
LE: loop exit
PB: predicated region body
PF: predicated region fallthrough
CT: control target
= control target key end

     0   :  { %v1592_v3 = vmov 0.0   ;;  %vm25_vm0 = vcmask 257024   ;;  %vm51_vm1 = vcmask 261120   ;;  %s1967_s0 = inlined_call_operand.vmem [shape: f32[32,32], index: 0, kind: input, shape index: {}]   ;;  %s1968_s1 = inlined_call_operand.vmem [shape: f32[32,32], index: 1, kind: input, shape index: {}]   ;;  %s1969_s2 = inlined_call_operand.vmem [shape: f32[32,32], index: 2, kind: input, shape index: {}]   ;;  %s1970_s3 = inlined_call_operand.vmem [shape: f32[1,32], index: 3, kind: input, shape index: {}]   ;;  %s1971_s4 = inlined_call_operand.vmem [shape: f32[3,32,64], index: 4, kind: input, shape index: {}]   ;;  %s1972_s5 = inlined_call_operand.hbm [shape: f32[32,32], index: 5, kind: output, shape index: {}]  }
   0x1   :  { %v43_v0 = vld [vmem:[%s1968_s1 + $0x18] sm:$0xff]  ;;  %v42_v1 = vld [vmem:[%s1968_s1 + $0x10] sm:$0xff]  ;;  %1393 = vmatprep.subr.mxu1 %v1592_v3  ;;  %v41_v5 = vld [vmem:[%s1968_s1 + $0x8] sm:$0xff]  ;;  %26 = vst.msk [vmem:[#allocation2] sm:$0xf] %vm25_vm0, %v1592_v3 }
   0x2   :  { %v1637_v2 = vld [vmem:[%s1969_s2 + $0x18] sm:$0xff]  ;;  %1379 = vmatprep.subr.mxu0 %v43_v0  ;;  %v1643_v4 = vld [vmem:[%s1969_s2 + $0x10] sm:$0xff]  ;;  %v36_v6 = vld [vmem:[%s1967_s0] sm:$0xff] }
   0x3   :  { %1380 = vmatpush3.msra.mxu0 %v43_v0  ;;  %1394 = vmatpush3.msra.mxu1 %v1637_v2 }
   0x4   :  { %1381 = vmatprep.subr.mxu0 %v42_v1  ;;  %1395 = vmatprep.subr.mxu1 %v1592_v3 }
   0x5   :  { %10 = vsyncpa [#allocation5], 0  ;;  %1382 = vmatpush3.msra.mxu0 %v42_v1  ;;  %1396 = vmatpush3.msra.mxu1 %v1643_v4  ;;  %v40_v7 = vld [vmem:[%s1968_s1] sm:$0xff]  ;;  %v1662_v8 = vld [vmem:[%s1969_s2 + $0x8] sm:$0xff]  ;;  %vm1593_vm2 = vmmov 0   ;;  %vm27_vm3 = vcmask 259072  }
   0x6   :  { %1383 = vmatprep.subr.mxu0 %v41_v5  ;;  %1397 = vmatprep.subr.mxu1 %v1592_v3  ;;  %v37_v9 = vld [vmem:[%s1967_s0 + $0x8] sm:$0xff]  ;;  %v1672_v10 = vld [vmem:[%s1969_s2] sm:$0xff]  ;;  %28 = vst.msk [vmem:[#allocation3] sm:$0x3f] %vm27_vm3, %v1592_v3  ;;  %29 = vst.msk [vmem:[#allocation3 + $0x8] sm:$0x3f] %vm27_vm3, %v1592_v3 }
   0x7   :  { %1384 = vmatpush3.msra.mxu0 %v41_v5  ;;  %1387 = vmatprep.mubr.msk.f32.mxu0 %vm51_vm1, %v36_v6  ;;  %30 = vst.msk [vmem:[#allocation3 + $0x10] sm:$0x3f] %vm27_vm3, %v1592_v3  ;;  %31 = vst.msk [vmem:[#allocation3 + $0x18] sm:$0x3f] %vm27_vm3, %v1592_v3  ;;  %v38_v12 = vld [vmem:[%s1967_s0 + $0x10] sm:$0xff]  ;;  %v39_v13 = vld [vmem:[%s1967_s0 + $0x18] sm:$0xff] }
   0x8   :  { %1385 = vmatprep.subr.mxu0 %v40_v7  ;;  %1398 = vmatpush3.msra.mxu1 %v1662_v8  ;;  %v153_v11 = vld [vmem:[#allocation2] sm:$0xf]  ;;  %32 = vst.msk [vmem:[#allocation3 + $0x20] sm:$0x3f] %vm27_vm3, %v1592_v3  ;;  %33 = vst.msk [vmem:[#allocation3 + $0x28] sm:$0x3f] %vm27_vm3, %v1592_v3 }
   0x9   :  { %1386 = vmatpush3.msra.mxu0 %v40_v7  ;;  %1399 = vmatprep.subr.mxu1 %v1592_v3  ;;  %34 = vst.msk [vmem:[#allocation3 + $0x30] sm:$0x3f] %vm27_vm3, %v1592_v3  ;;  %35 = vst.msk [vmem:[#allocation3 + $0x38] sm:$0x3f] %vm27_vm3, %v1592_v3  ;;  %v1722_v15 = vld [vmem:[%s1970_s3] ss:$0 sm:$0xff] }
   0xa   :  { %1388 = vmatmul.mubr.msk.f32.vlgmr.msra.gmra.mxu0 %vm51_vm1, %v37_v9  ;;  %1400 = vmatpush3.msra.mxu1 %v1672_v10  ;;  %vm310_vm4 = vcmask 261124   ;;  %vm1049_vm5 = vcmask 1041408   ;;  %vm1050_vm6 = vcmask 1045508   ;;  %v1278_v9 = vld [vmem:[%s1971_s4 + $0x38] sm:$0xff]  ;;  %vm815_vm8 = vcmask 1042432   ;;  %s1595_s2 = smov [#allocation4]  }
   0xb   :  { %1401 = vmatprep.mubr.msk.f32.mxu1 %vm1593_vm2, %v1592_v3  ;;  %1404 = vmatprep.subr.mxu0 %v1592_v3  ;;  %vm1765_vm7 = vmor %vm1049_vm5, %vm1050_vm6  ;;  %vm816_vm9 = vcmask 1046532   ;;  %s1243_s13 = sshll.u32 %s1595_s2, 4  ;;  %s1244_s13 = int_to_ptr.vmem [resolvable:$true] %s1243_s13 }
   0xc   :  { %1402 = vmatmul.mubr.msk.f32.vlgmr.msra.gmra.mxu1 %vm51_vm1, %v153_v11  ;;  %1405 = vmatpush3.msra.mxu0 %v1637_v2  ;;  %vm1849_vm10 = vmor %vm815_vm8, %vm816_vm9  ;;  %s1570_s14 = scalar_lea.vmem %s1244_s13, 512  ;;  %p1575_p1 = scmp.lt.s32.totalorder %s1244_s13, %s1244_s13 }
   0xd   :  { %1406 = vmatprep.subr.mxu0 %v1592_v3  ;;  %1415 = vmatprep.subr.mxu1 %v1592_v3  ;;  %p1571_p0 = scmp.ne.s32.totalorder %s1244_s13, %s1570_s14  ;;  %p1576_p2 = scmp.lt.s32.totalorder %s1570_s14, %s1570_s14 }
   0xe   :  { %1407 = vmatpush3.msra.mxu0 %v1643_v4  ;;  %1416 = vmatpush3.msra.mxu1 %v1637_v2 }
   0xf   :  { %1408 = vmatprep.subr.mxu0 %v1592_v3  ;;  %1417 = vmatprep.subr.mxu1 %v1592_v3  ;;  %p1577_p3 = por %p1576_p2, %p1575_p1 }
  0x10   :  { %1409 = vmatpush3.msra.mxu0 %v1662_v8  ;;  %1418 = vmatpush3.msra.mxu1 %v1643_v4 }
  0x11   :  { %1410 = vmatprep.subr.mxu0 %v1592_v3  ;;  %1419 = vmatprep.subr.mxu1 %v1592_v3  ;;  %p1578_p4 = pnand %p1577_p3, %p1571_p0 }
  0x12   :  { %1411 = vmatpush3.msra.mxu0 %v1672_v10  ;;  %1420 = vmatpush3.msra.mxu1 %v1662_v8 }
  0x13   :  { %1421 = vmatprep.subr.mxu1 %v1592_v3  ;;  %1423 = vmatprep.mubr.msk.f32.mxu1 %vm1593_vm2, %v1592_v3 }
  0x14   :  { %1422 = vmatpush3.msra.mxu1 %v1672_v10  ;;  %1426 = vmatprep.subr.mxu0 %v1592_v3 }
  0x15   :  { %1437 = vmatprep.subr.mxu1 %v1592_v3  ;;  %1390 = vmatprep.mubr.msk.f32.mxu0 %vm51_vm1, %v38_v12 }
  0x16   :  { %1391 = vmatmul.mubr.msk.f32.gmra.mxu0 %vm51_vm1, %v39_v13 }
  0x17   :  { %1412 = vmatprep.mubr.msk.f32.mxu0 %vm1593_vm2, %v1592_v3 }
  0xca   :  { %v1389_v14 = vpop.f32.mrf.mxu0 }
  0xcb   :  { %v136_v42 = vadd.f32 %v1389_v14, %v1722_v15 }
  0xcc   :  { %v130_v16 = vpop.f32.mrf.mxu0  ;;  %v223_v17 = vpop.f32.mrf.mxu1 }
  0xcd   :  { %v131_v18 = vadd.f32 %v1722_v15, %v130_v16 }
  0xce   :  { %v1403_v19 = vpop.f32.mrf.mxu1 }
  0xcf   :  { %v227_v20 = vadd.f32 %v223_v17, %v131_v18 }
  0xd1   :  { %1538 = vtanh.f32 %v227_v20  ;;  %v1277_v20 = vld [vmem:[%s1971_s4 + $0x30] sm:$0xff] }
  0xd6   :  { %v1737_v22 = vpop.f32.mrf.mxu0 }
  0xd8   :  { %v1739_v23 = vpop.f32.mrf.mxu0 }
  0xd9   :  { %v141_v0 = vadd.f32 %v1722_v15, %v1739_v23 }
  0xde   :  { %v1539_v21 = vpop.eup %1538 }
  0xdf   :  { %230 = vst.msk [vmem:[#allocation3 + $0x1] sm:$0xf] %vm25_vm0, %v1539_v21  ;;  %1413 = vmatmul.mubr.msk.f32.vlgmr.msra.gmra.mxu0 %vm51_vm1, %v1539_v21 }
  0xe0   :  { %1427 = vmatpush3.msra.mxu0 %v1637_v2  ;;  %1434 = vmatprep.mubr.msk.f32.mxu0 %vm1593_vm2, %v1592_v3 }
  0xe1   :  { %1428 = vmatprep.subr.mxu0 %v1592_v3 }
  0xe2   :  { %1429 = vmatpush3.msra.mxu0 %v1643_v4 }
  0xe3   :  { %1430 = vmatprep.subr.mxu0 %v1592_v3 }
  0xe4   :  { %1431 = vmatpush3.msra.mxu0 %v1662_v8 }
  0xe5   :  { %1432 = vmatprep.subr.mxu0 %v1592_v3 }
  0xe6   :  { %1433 = vmatpush3.msra.mxu0 %v1672_v10  ;;  %v1742_v30 = vld [vmem:[#allocation3] sm:$0x3f] }
  0xe7   :  { %1448 = vmatprep.subr.mxu0 %v1592_v3  ;;  %v1751_v31 = vcombine.high %v1742_v30, %v1742_v30  ;;  %v1287_v36 = vrot.slane %v1742_v30, 10  ;;  %v1267_v14 = vrot.slane %v1742_v30, 9 }
  0xe9   :  { %v1054_v34 = vrot.slane %v1751_v31, 6 }
  0xeb   :  { %v1775_v39 = vsel %vm1765_vm7, %v1287_v36, %v1054_v34 }
 0x19f   :  { %v300_v24 = vpop.f32.mrf.mxu0 }
 0x1a0   :  { %v305_v25 = vrot.slane %v300_v24, 4 }
 0x1a1   :  { %v1414_v26 = vpop.f32.mrf.mxu0 }
 0x1a2   :  { %v307_v27 = vadd.f32 %v305_v25, %v131_v18  ;;  %v1276_v25 = vld [vmem:[%s1971_s4 + $0x28] sm:$0xff] }
 0x1a4   :  { %1540 = vtanh.f32 %v307_v27 }
 0x1b1   :  { %v1541_v28 = vpop.eup %1540 }
 0x1b2   :  { %311 = vst.msk [vmem:[#allocation3 + $0x5] sm:$0xf0] %vm310_vm4, %v1541_v28  ;;  %v313_v29 = vrot.slane %v1541_v28, 4 }
 0x1b4   :  { %1424 = vmatmul.mubr.msk.f32.vlgmr.msra.gmra.mxu1 %vm51_vm1, %v313_v29  ;;  %v1275_v29 = vld [vmem:[%s1971_s4 + $0x20] sm:$0xff] }
 0x1b5   :  { %1438 = vmatpush3.msra.mxu1 %v1637_v2  ;;  %1445 = vmatprep.mubr.msk.f32.mxu1 %vm1593_vm2, %v1592_v3 }
 0x1b6   :  { %1439 = vmatprep.subr.mxu1 %v1592_v3 }
 0x1b7   :  { %1440 = vmatpush3.msra.mxu1 %v1643_v4 }
 0x1b8   :  { %1441 = vmatprep.subr.mxu1 %v1592_v3 }
 0x1b9   :  { %1442 = vmatpush3.msra.mxu1 %v1662_v8  ;;  %v1756_v32 = vld [vmem:[#allocation3 + $0x8] sm:$0x3f] }
 0x1ba   :  { %1443 = vmatprep.subr.mxu1 %v1592_v3  ;;  %v1761_v33 = vcombine.high %v1756_v32, %v1756_v32  ;;  %v1288_v37 = vrot.slane %v1756_v32, 10 }
 0x1bb   :  { %1444 = vmatpush3.msra.mxu1 %v1672_v10 }
 0x1bc   :  { %1459 = vmatprep.subr.mxu1 %v1592_v3  ;;  %v1058_v38 = vrot.slane %v1761_v33, 6 }
 0x1be   :  { %v1779_v40 = vsel %vm1765_vm7, %v1288_v37, %v1058_v38 }
 0x1bf   :  { %v1089_v41 = vcombine.low %v1775_v39, %v1779_v40 }
 0x274   :  { %v382_v43 = vpop.f32.mrf.mxu1 }
 0x275   :  { %v386_v44 = vadd.f32 %v382_v43, %v136_v42 }
 0x276   :  { %v1425_v45 = vpop.f32.mrf.mxu1 }
 0x277   :  { %1542 = vtanh.f32 %v386_v44 }
 0x284   :  { %v1543_v46 = vpop.eup %1542 }
 0x285   :  { %389 = vst.msk [vmem:[#allocation3 + $0x11] sm:$0xf] %vm25_vm0, %v1543_v46  ;;  %1435 = vmatmul.mubr.msk.f32.vlgmr.msra.gmra.mxu0 %vm51_vm1, %v1543_v46 }
 0x286   :  { %1449 = vmatpush3.msra.mxu0 %v1637_v2  ;;  %1456 = vmatprep.mubr.msk.f32.mxu0 %vm1593_vm2, %v1592_v3 }
 0x287   :  { %1450 = vmatprep.subr.mxu0 %v1592_v3 }
 0x288   :  { %1451 = vmatpush3.msra.mxu0 %v1643_v4 }
 0x289   :  { %1452 = vmatprep.subr.mxu0 %v1592_v3 }
 0x28a   :  { %1453 = vmatpush3.msra.mxu0 %v1662_v8 }
 0x28b   :  { %1454 = vmatprep.subr.mxu0 %v1592_v3 }
 0x28c   :  { %1455 = vmatpush3.msra.mxu0 %v1672_v10  ;;  %v1797_v53 = vld [vmem:[#allocation3 + $0x10] sm:$0x3f] }
 0x28d   :  { %1470 = vmatprep.subr.mxu0 %v1592_v3  ;;  %v1806_v54 = vcombine.high %v1797_v53, %v1797_v53  ;;  %v1289_v59 = vrot.slane %v1797_v53, 10 }
 0x28f   :  { %v1062_v57 = vrot.slane %v1806_v54, 6  ;;  %v828_v26 = vrot.slane %v1806_v54, 5 }
 0x291   :  { %v1822_v61 = vsel %vm1765_vm7, %v1289_v59, %v1062_v57  ;;  %v146_v59 = vadd.f32 %v1737_v22, %v1722_v15  ;;  %v796_v15 = vld [vmem:[%s1971_s4 + $0x8] sm:$0xff]  ;;  %v795_v22 = vld [vmem:[%s1971_s4] sm:$0xff] }
 0x345   :  { %v459_v47 = vpop.f32.mrf.mxu0 }
 0x346   :  { %v464_v48 = vrot.slane %v459_v47, 4 }
 0x347   :  { %v1436_v49 = vpop.f32.mrf.mxu0 }
 0x348   :  { %v466_v50 = vadd.f32 %v464_v48, %v136_v42 }
 0x34a   :  { %1544 = vtanh.f32 %v466_v50 }
 0x357   :  { %v1545_v51 = vpop.eup %1544 }
 0x358   :  { %469 = vst.msk [vmem:[#allocation3 + $0x15] sm:$0xf0] %vm310_vm4, %v1545_v51  ;;  %v471_v52 = vrot.slane %v1545_v51, 4 }
 0x35a   :  { %1446 = vmatmul.mubr.msk.f32.vlgmr.msra.gmra.mxu1 %vm51_vm1, %v471_v52 }
 0x35b   :  { %1460 = vmatpush3.msra.mxu1 %v1637_v2  ;;  %1467 = vmatprep.mubr.msk.f32.mxu1 %vm1593_vm2, %v1592_v3 }
 0x35c   :  { %1461 = vmatprep.subr.mxu1 %v1592_v3 }
 0x35d   :  { %1462 = vmatpush3.msra.mxu1 %v1643_v4 }
 0x35e   :  { %1463 = vmatprep.subr.mxu1 %v1592_v3 }
 0x35f   :  { %1464 = vmatpush3.msra.mxu1 %v1662_v8  ;;  %v1811_v55 = vld [vmem:[#allocation3 + $0x18] sm:$0x3f] }
 0x360   :  { %1465 = vmatprep.subr.mxu1 %v1592_v3  ;;  %v810_v56 = vcombine.high %v1811_v55, %v1811_v55  ;;  %v1290_v60 = vrot.slane %v1811_v55, 10  ;;  %v1270_v27 = vrot.slane %v1811_v55, 9 }
 0x361   :  { %1466 = vmatpush3.msra.mxu1 %v1672_v10 }
 0x362   :  { %v1066_v58 = vrot.slane %v810_v56, 6  ;;  %1481 = vmatprep.subr.mxu1 %v1278_v9  ;;  %v832_v23 = vrot.slane %v810_v56, 5 }
 0x364   :  { %v1826_v62 = vsel %vm1765_vm7, %v1290_v60, %v1066_v58  ;;  %v798_v58 = vld [vmem:[%s1971_s4 + $0x18] sm:$0xff] }
 0x365   :  { %v1090_v63 = vcombine.low %v1822_v61, %v1826_v62 }
 0x41a   :  { %v540_v1 = vpop.f32.mrf.mxu1 }
 0x41b   :  { %v544_v5 = vadd.f32 %v540_v1, %v141_v0 }
 0x41c   :  { %v1447_v6 = vpop.f32.mrf.mxu1 }
 0x41d   :  { %1546 = vtanh.f32 %v544_v5  ;;  %v797_v6 = vld [vmem:[%s1971_s4 + $0x10] sm:$0xff] }
 0x42a   :  { %v1547_v7 = vpop.eup %1546 }
 0x42b   :  { %547 = vst.msk [vmem:[#allocation3 + $0x21] sm:$0xf] %vm25_vm0, %v1547_v7  ;;  %1457 = vmatmul.mubr.msk.f32.vlgmr.msra.gmra.mxu0 %vm51_vm1, %v1547_v7  ;;  %v952_v7 = vcombine.low %v1742_v30, %v1756_v32  ;;  %v953_v30 = vcombine.low %v1797_v53, %v1811_v55  ;;  %v1295_v55 = vld [vmem:[%s1971_s4 + $0x40] sm:$0xff] }
 0x42c   :  { %1471 = vmatpush3.msra.mxu0 %v1637_v2  ;;  %1478 = vmatprep.mubr.msk.f32.mxu0 %vm1593_vm2, %v1592_v3 }
 0x42d   :  { %1472 = vmatprep.subr.mxu0 %v1592_v3 }
 0x42e   :  { %1473 = vmatpush3.msra.mxu0 %v1643_v4  ;;  %v824_v4 = vrot.slane %v1761_v33, 5  ;;  %v833_v33 = vsel %vm1849_vm10, %v1270_v27, %v832_v23 }
 0x42f   :  { %1474 = vmatprep.subr.mxu0 %v1592_v3 }
 0x430   :  { %1475 = vmatpush3.msra.mxu0 %v1662_v8  ;;  %v820_v8 = vrot.slane %v1751_v31, 5  ;;  %v1269_v31 = vrot.slane %v1797_v53, 9  ;;  %v1296_v53 = vld [vmem:[%s1971_s4 + $0x48] sm:$0xff] }
 0x431   :  { %1476 = vmatprep.subr.mxu0 %v1592_v3  ;;  %v1268_v3 = vrot.slane %v1756_v32, 9 }
 0x432   :  { %1477 = vmatpush3.msra.mxu0 %v1672_v10  ;;  %v821_v19 = vsel %vm1849_vm10, %v1267_v14, %v820_v8  ;;  %v1862_v24 = vld [vmem:[#allocation3 + $0x20] sm:$0x3f]  ;;  %v829_v34 = vsel %vm1849_vm10, %v1269_v31, %v828_v26 }
 0x433   :  { %v825_v16 = vsel %vm1849_vm10, %v1268_v3, %v824_v4  ;;  %v811_v28 = vcombine.high %v1862_v24, %v1862_v24  ;;  %v856_v37 = vcombine.low %v829_v34, %v833_v33  ;;  %v1271_v44 = vrot.slane %v1862_v24, 9  ;;  %1495 = vmatprep.subr.mxu0 %v798_v58 }
 0x434   :  { %v855_v21 = vcombine.low %v821_v19, %v825_v16  ;;  %v1291_v45 = vrot.slane %v1862_v24, 10 }
 0x435   :  { %v836_v42 = vrot.slane %v811_v28, 5  ;;  %v1070_v43 = vrot.slane %v811_v28, 6 }
 0x437   :  { %v837_v50 = vsel %vm1849_vm10, %v1271_v44, %v836_v42  ;;  %v1890_v52 = vsel %vm1765_vm7, %v1291_v45, %v1070_v43 }
 0x4eb   :  { %v617_v2 = vpop.f32.mrf.mxu0 }
 0x4ec   :  { %v622_v11 = vrot.slane %v617_v2, 4  ;;  %v1297_v2 = vld [vmem:[%s1971_s4 + $0x50] sm:$0xff] }
 0x4ed   :  { %v1458_v12 = vpop.f32.mrf.mxu0 }
 0x4ee   :  { %v624_v13 = vadd.f32 %v622_v11, %v141_v0 }
 0x4f0   :  { %1548 = vtanh.f32 %v624_v13 }
 0x4fd   :  { %v1549_v17 = vpop.eup %1548 }
 0x4fe   :  { %627 = vst.msk [vmem:[#allocation3 + $0x25] sm:$0xf0] %vm310_vm4, %v1549_v17  ;;  %v629_v18 = vrot.slane %v1549_v17, 4 }
 0x500   :  { %1468 = vmatmul.mubr.msk.f32.vlgmr.msra.gmra.mxu1 %vm51_vm1, %v629_v18 }
 0x501   :  { %1482 = vmatpush3.msra.mxu1 %v1278_v9  ;;  %1489 = vmatprep.mubr.msk.f32.mxu1 %vm51_vm1, %v855_v21  ;;  %v1298_v9 = vld [vmem:[%s1971_s4 + $0x58] sm:$0xff]  ;;  %s1594_s4 = smov 96  }
 0x502   :  { %1483 = vmatprep.subr.mxu1 %v1277_v20 }
 0x503   :  { %1484 = vmatpush3.msra.mxu1 %v1277_v20 }
 0x504   :  { %1485 = vmatprep.subr.mxu1 %v1276_v25 }
 0x505   :  { %1486 = vmatpush3.msra.mxu1 %v1276_v25  ;;  %v792_v36 = vld [vmem:[#allocation3 + $0x28] sm:$0x3f] }
 0x506   :  { %1487 = vmatprep.subr.mxu1 %v1275_v29  ;;  %v812_v38 = vcombine.high %v792_v36, %v792_v36  ;;  %v1272_v46 = vrot.slane %v792_v36, 9  ;;  %v1292_v48 = vrot.slane %v792_v36, 10  ;;  %v954_v32 = vcombine.low %v1862_v24, %v792_v36 }
 0x507   :  { %1488 = vmatpush3.msra.mxu1 %v1275_v29 }
 0x508   :  { %1490 = vmatmul.mubr.msk.f32.vlgmr.msra.gmra.mxu1 %vm51_vm1, %v856_v37  ;;  %v840_v47 = vrot.slane %v812_v38, 5  ;;  %v1074_v49 = vrot.slane %v812_v38, 6  ;;  %1509 = vmatprep.subr.mxu1 %v1298_v9 }
 0x509   :  { %1510 = vmatpush3.msra.mxu1 %v1298_v9 }
 0x50a   :  { %v841_v51 = vsel %vm1849_vm10, %v1272_v46, %v840_v47  ;;  %v1894_v54 = vsel %vm1765_vm7, %v1292_v48, %v1074_v49  ;;  %1511 = vmatprep.subr.mxu1 %v1297_v2 }
 0x50b   :  { %v857_v56 = vcombine.low %v837_v50, %v841_v51  ;;  %v1091_v57 = vcombine.low %v1890_v52, %v1894_v54  ;;  %1512 = vmatpush3.msra.mxu1 %v1297_v2 }
 0x50c   :  { %1513 = vmatprep.subr.mxu1 %v1296_v53 }
 0x50d   :  { %1492 = vmatprep.mubr.msk.f32.mxu1 %vm51_vm1, %v857_v56  ;;  %1514 = vmatpush3.msra.mxu1 %v1296_v53 }
 0x50e   :  { %1515 = vmatprep.subr.mxu1 %v1295_v55 }
 0x50f   :  { %1516 = vmatpush3.msra.mxu1 %v1295_v55 }
 0x5c0   :  { %v698_v60 = vpop.f32.mrf.mxu1 }
 0x5c1   :  { %v702_v0 = vadd.f32 %v698_v60, %v146_v59 }
 0x5c2   :  { %v1469_v1 = vpop.f32.mrf.mxu1 }
 0x5c3   :  { %1550 = vtanh.f32 %v702_v0 }
 0x5d0   :  { %v1551_v5 = vpop.eup %1550 }
 0x5d1   :  { %705 = vst.msk [vmem:[#allocation3 + $0x31] sm:$0xf] %vm25_vm0, %v1551_v5  ;;  %1479 = vmatmul.mubr.msk.f32.vlgmr.msra.gmra.mxu0 %vm51_vm1, %v1551_v5 }
 0x5d2   :  { %1496 = vmatpush3.msra.mxu0 %v798_v58  ;;  %1503 = vmatprep.mubr.msk.f32.mxu0 %vm51_vm1, %v952_v7 }
 0x5d3   :  { %1497 = vmatprep.subr.mxu0 %v797_v6 }
 0x5d4   :  { %1498 = vmatpush3.msra.mxu0 %v797_v6 }
 0x5d5   :  { %1499 = vmatprep.subr.mxu0 %v796_v15 }
 0x5d6   :  { %1500 = vmatpush3.msra.mxu0 %v796_v15 }
 0x5d7   :  { %1501 = vmatprep.subr.mxu0 %v795_v22 }
 0x5d8   :  { %1502 = vmatpush3.msra.mxu0 %v795_v22  ;;  %v793_v3 = vld [vmem:[#allocation3 + $0x30] sm:$0x3f] }
 0x5d9   :  { %1504 = vmatmul.mubr.msk.f32.vlgmr.msra.gmra.mxu0 %vm51_vm1, %v953_v30  ;;  %v813_v14 = vcombine.high %v793_v3, %v793_v3  ;;  %v1273_v20 = vrot.slane %v793_v3, 9  ;;  %v1293_v31 = vrot.slane %v793_v3, 10 }
 0x5da   :  { %1506 = vmatprep.mubr.msk.f32.mxu0 %vm51_vm1, %v954_v32 }
 0x5db   :  { %v844_v19 = vrot.slane %v813_v14, 5  ;;  %v1078_v28 = vrot.slane %v813_v14, 6 }
 0x5dd   :  { %v845_v24 = vsel %vm1849_vm10, %v1273_v20, %v844_v19  ;;  %v1079_v39 = vsel %vm1765_vm7, %v1293_v31, %v1078_v28 }
 0x691   :  { %v775_v11 = vpop.f32.mrf.mxu0 }
 0x692   :  { %v780_v12 = vrot.slane %v775_v11, 4 }
 0x693   :  { %v1480_v13 = vpop.f32.mrf.mxu0 }
 0x694   :  { %v782_v4 = vadd.f32 %v780_v12, %v146_v59 }
 0x696   :  { %1552 = vtanh.f32 %v782_v4 }
 0x699   :  { %v1505_v34 = vpop.f32.mrf.mxu0 }
 0x69b   :  { %v1030_v37 = vpop.f32.mrf.mxu0 }
 0x6a3   :  { %v1553_v8 = vpop.eup %1552 }
 0x6a4   :  { %785 = vst.msk [vmem:[#allocation3 + $0x35] sm:$0xf0] %vm310_vm4, %v1553_v8  ;;  %786 = vst.msk [vmem:[#allocation2 - $0x4] sm:$0xf0] %vm310_vm4, %v1553_v8 }
 0x6ab   :  { %v794_v16 = vld [vmem:[#allocation3 + $0x38] sm:$0x3f] }
 0x6ac   :  { %v955_v17 = vcombine.low %v793_v3, %v794_v16  ;;  %v814_v18 = vcombine.high %v794_v16, %v794_v16  ;;  %v1274_v21 = vrot.slane %v794_v16, 9  ;;  %v1294_v29 = vrot.slane %v794_v16, 10 }
 0x6ae   :  { %1507 = vmatmul.mubr.msk.f32.gmra.mxu0 %vm51_vm1, %v955_v17  ;;  %v848_v23 = vrot.slane %v814_v18, 5  ;;  %v1082_v27 = vrot.slane %v814_v18, 6 }
 0x6b0   :  { %v849_v25 = vsel %vm1849_vm10, %v1274_v21, %v848_v23  ;;  %v1083_v33 = vsel %vm1765_vm7, %v1294_v29, %v1082_v27 }
 0x6b1   :  { %v858_v26 = vcombine.low %v845_v24, %v849_v25  ;;  %v1092_v40 = vcombine.low %v1079_v39, %v1083_v33 }
 0x6b3   :  { %1493 = vmatmul.mubr.msk.f32.gmra.mxu1 %vm51_vm1, %v858_v26 }
 0x6b4   :  { %1517 = vmatprep.mubr.msk.f32.mxu1 %vm51_vm1, %v1089_v41  ;;  %v1491_v41 = vpop.f32.mrf.mxu1 }
 0x6b5   :  { %v1036_v61 = vadd.f32 %v1505_v34, %v1491_v41 }
 0x6b6   :  { %v933_v10 = vpop.f32.mrf.mxu1 }
 0x6b7   :  { %1518 = vmatmul.mubr.msk.f32.vlgmr.msra.gmra.mxu1 %vm51_vm1, %v1090_v63  ;;  %v1031_v42 = vadd.f32 %v1030_v37, %v933_v10 }
 0x6b8   :  { %1520 = vmatprep.mubr.msk.f32.mxu1 %vm51_vm1, %v1091_v57 }
 0x6bb   :  { %1521 = vmatmul.mubr.msk.f32.gmra.mxu1 %vm51_vm1, %v1092_v40 }
 0x76e   :  { %v1508_v62 = vpop.f32.mrf.mxu0 }
 0x770   :  { %v1040_v35 = vpop.f32.mrf.mxu0 }
 0x773   :  { %v1494_v36 = vpop.f32.mrf.mxu1 }
 0x774   :  { %v1046_v45 = vadd.f32 %v1508_v62, %v1494_v36 }
 0x775   :  { %v943_v38 = vpop.f32.mrf.mxu1 }
 0x776   :  { %v1041_v49 = vadd.f32 %v1040_v35, %v943_v38 }
 0x777   :  { %v1519_v63 = vpop.f32.mrf.mxu1 }
 0x778   :  { %v1187_v43 = vadd.f32 %v1519_v63, %v1036_v61 }
 0x779   :  { %v1167_v44 = vpop.f32.mrf.mxu1 }
 0x77a   :  { %v1304_v46 = vmul.f32 -1.442695, %v1187_v43  ;;  %v1186_v47 = vadd.f32 %v1167_v44, %v1031_v42 }
 0x77b   :  { %v1522_v48 = vpop.f32.mrf.mxu1 }
 0x77c   :  { %v1303_v50 = vmul.f32 -1.442695, %v1186_v47  ;;  %v1189_v51 = vadd.f32 %v1522_v48, %v1046_v45  ;;  %1554 = vpow2.f32 %v1304_v46 }
 0x77d   :  { %v1177_v52 = vpop.f32.mrf.mxu1 }
 0x77e   :  { %1556 = vpow2.f32 %v1303_v50  ;;  %v1306_v54 = vmul.f32 -1.442695, %v1189_v51  ;;  %v1188_v56 = vadd.f32 %v1177_v52, %v1041_v49 }
 0x780   :  { %v1305_v57 = vmul.f32 -1.442695, %v1188_v56  ;;  %1558 = vpow2.f32 %v1306_v54 }
 0x782   :  { %1560 = vpow2.f32 %v1305_v57 }
 0x789   :  { %v1555_v58 = vpop.eup %1554 }
 0x78a   :  { %v1203_v0 = vadd.f32 1.0, %v1555_v58 }
 0x78b   :  { %v1557_v59 = vpop.eup %1556 }
 0x78c   :  { %v1202_v60 = vadd.f32 1.0, %v1557_v59 }
 0x78d   :  { %v1559_v1 = vpop.eup %1558 }
 0x78e   :  { %1562 = vrcp.f32 %v1202_v60  ;;  %v1205_v7 = vadd.f32 1.0, %v1559_v1 }
 0x78f   :  { %v1561_v5 = vpop.eup %1560  ;;  %1564 = vrcp.f32 %v1203_v0 }
 0x790   :  { %v1204_v6 = vadd.f32 1.0, %v1561_v5 }
 0x792   :  { %1566 = vrcp.f32 %v1204_v6 }
 0x793   :  { %1568 = vrcp.f32 %v1205_v7 }
 0x79b   :  { %v1563_v15 = vpop.eup %1562 }
 0x79c   :  { %1218 = vrot.lane.b32.xlu0 %v1563_v15, %s1594_s4  ;;  %v1565_v22 = vpop.eup %1564 }
 0x79f   :  { %v1567_v30 = vpop.eup %1566 }
 0x7a0   :  { %1220 = vrot.lane.b32.xlu0 %v1565_v22, %s1594_s4  ;;  %1222 = vrot.lane.b32.xlu1 %v1567_v30, %s1594_s4  ;;  %v1569_v32 = vpop.eup %1568 }
 0x7a4   :  { %1224 = vrot.lane.b32.xlu1 %v1569_v32, %s1594_s4 }
 0x80e   :  { %v1219_v9 = vpop.permute.xlu0 %1218 }
 0x80f   :  { %v1230_v2 = vmul.f32 %v1219_v9, %v1186_v47 }
 0x811   :  { %1234 = vst.msk [vmem:[#allocation4] sm:$0xff] %vm51_vm1, %v1230_v2 }
 0x812   :  { %v1221_v53 = vpop.permute.xlu0 %1220  ;;  %v1223_v55 = vpop.permute.xlu1 %1222 }
 0x813   :  { %v1231_v11 = vmul.f32 %v1221_v53, %v1187_v43  ;;  %v1232_v12 = vmul.f32 %v1223_v55, %v1188_v56 }
 0x815   :  { %1235 = vst.msk [vmem:[#allocation4 + $0x8] sm:$0xff] %vm51_vm1, %v1231_v11  ;;  %1236 = vst.msk [vmem:[#allocation4 + $0x10] sm:$0xff] %vm51_vm1, %v1232_v12 }
 0x816   :  { %v1225_v13 = vpop.permute.xlu1 %1224 }
 0x817   :  { %v1233_v4 = vmul.f32 %v1225_v13, %v1189_v51 }
 0x819   :  { %1237 = vst.msk [vmem:[#allocation4 + $0x18] sm:$0xff] %vm51_vm1, %v1233_v4 }
 0x81a   :  { %1581 = shalt.err (!%p1578_p4)
}
 0x81b   :  { %s1596_s15 = smov 128   ;;  %s1597_s16 = smov 8  }
 0x81c   :  { %1249 = dma.vmem_to_hbm [thread:$0]  %s1244_s13, 512, %s1972_s5, [#allocation5], %s1596_s15, %s1596_s15, %s1597_s16  }
 0x81d   :  { %1590 = dma.done.wait [#allocation5], 512  }
 0x81e   :  { %1591 = vsyncadd [#allocation5], 4294966784 }
 0x81f   :  { %1253 = vsyncpa [#allocation5], 1 }

</bundles_post_ra>
